<compile_context>
chip_gen: v7x
topology: tpu7x:2x2x1
jax: 0.10.0
libtpu: 0.0.40
codegen_flags: <defaults>
</compile_context>

<pallas_src>
import jax
import jax.numpy as jnp
from jax.experimental import pallas as pl
from jax.experimental.pallas import tpu as pltpu


# ---------------------------------------------------------------------------
# Kernel: unconditional per-row affine, o = x * scale + bias (f32 accumulate).
# ---------------------------------------------------------------------------
def _affine_kernel(x_ref, scale_ref, bias_ref, o_ref):
    x = x_ref[...].astype(jnp.float32)            # [tr, tl]
    y = x * scale_ref[...] + bias_ref[...]        # scale/bias: [tr, 1] broadcast
    o_ref[...] = y.astype(o_ref.dtype)


# ---------------------------------------------------------------------------
# Tiling helpers.
# ---------------------------------------------------------------------------
def _round_up(n, m):
    return ((n + m - 1) // m) * m


def _pick_tile(dim, align, cap):
    """Largest tile <= cap that is a multiple of `align` and divides `dim`.
    The wrapper pads `dim` to a multiple of `align`, so this always terminates
    (worst case: align itself).  No full-dim fallback."""
    if dim <= cap:
        return dim
    t = (cap // align) * align
    while t > align and dim % t != 0:
        t -= align
    return t


def _budget():
    """Generation-aware (target_tile_bytes, vmem_limit_bytes).

    Live VMEM ~= 2 in-bufs + 2 out-bufs = 4x tile, plus ~1-2 MiB of lane-padded
    scale/bias buffers.  v5e/v6e (128 MiB VMEM): 4 MiB tiles / 32 MiB limit
    (the 32 MiB limit raises v5e's 16 MiB default).  v7x (64 MiB VMEM): 8 MiB
    tiles / 40 MiB limit.  The fallback (8 MiB / 40 MiB) is safe on every
    generation's physical VMEM."""
    try:
        vmem_cap = pltpu.get_tpu_info().vmem_capacity_bytes
    except Exception:
        vmem_cap = 64 << 20
    if vmem_cap >= (96 << 20):        # v5e / v6e
        return 4 << 20, 32 << 20
    return 8 << 20, 40 << 20          # v7x-class


def _affine_pallas(x2, scale_rows, bias_rows, sub_align):
    R, L = x2.shape                   # R multiple of sub_align, L multiple of 128
    itemsize = jnp.dtype(x2.dtype).itemsize
    tile_bytes, vmem_limit = _budget()

    # Lane-dense column tile (unmasked vst), then row tile from the byte budget.
    tl = _pick_tile(L, 128, 2048)
    row_cap = min(2048, tile_bytes // (tl * itemsize))
    row_cap = max(sub_align, (row_cap // sub_align) * sub_align)
    tr = _pick_tile(R, sub_align, row_cap)

    # Make sure both TensorCores (v7x) have at least one block to chew on.
    if (R // tr) * (L // tl) < 2:
        if tl % 256 == 0:
            tl //= 2
        elif tr % (2 * sub_align) == 0:
            tr //= 2

    grid = (R // tr, L // tl)         # lane axis last/fastest -> scale/bias stay resident

    return pl.pallas_call(
        _affine_kernel,
        out_shape=jax.ShapeDtypeStruct((R, L), x2.dtype),
        grid=grid,
        in_specs=[
            pl.BlockSpec((tr, tl), lambda i, j: (i, j)),
            # scale/bias: constant along the lane axis -> not re-DMA'd per j step.
            pl.BlockSpec((tr, 1), lambda i, j: (i, 0)),
            pl.BlockSpec((tr, 1), lambda i, j: (i, 0)),
        ],
        out_specs=pl.BlockSpec((tr, tl), lambda i, j: (i, j)),
        # In-place: output block (i,j) depends only on input block (i,j), so
        # aliasing the output onto x2 is hazard-free and saves one full slab
        # of HBM write allocation.
        input_output_aliases={0: 0},
        compiler_params=pltpu.CompilerParams(
            dimension_semantics=("parallel", "parallel"),
            vmem_limit_bytes=vmem_limit),
    )(x2, scale_rows, bias_rows)


def _affine_apply(x2, scale_rows, bias_rows):
    """Pad to legal (sublane, 128-lane) multiples, run the kernel, slice back."""
    R, L = x2.shape
    itemsize = jnp.dtype(x2.dtype).itemsize
    sub_align = {4: 8, 2: 16, 1: 32}.get(itemsize, 8)   # dtype-aware sublane align

    Rp = _round_up(R, sub_align)
    Lp = _round_up(L, 128)
    padded = (Rp != R) or (Lp != L)
    if padded:
        x2p = jnp.pad(x2, ((0, Rp - R), (0, Lp - L)))
        sr = jnp.pad(scale_rows, ((0, Rp - R), (0, 0)), constant_values=1.0)
        br = jnp.pad(bias_rows, ((0, Rp - R), (0, 0)))
    else:
        x2p, sr, br = x2, scale_rows, bias_rows

    out = _affine_pallas(x2p, sr, br, sub_align)
    if padded:
        out = out[:R, :L]
    return out


# ---------------------------------------------------------------------------
# RandomApply wrapper.
# ---------------------------------------------------------------------------
def _random_apply_impl(x, scale, bias, p, key):
    """RandomApply(fn, p)(x) where fn = per-channel affine with (scale, bias).

    x:     [B, C, H, W] (NCHW), f32 or bf16 (kept in its dtype end-to-end)
    scale: [C], bias: [C]
    p:     python float (static), probability of applying fn
    key:   jax PRNGKey driving the Bernoulli draw
    """
    B, C, H, W = x.shape
    R, L = B * C, H * W

    # Bernoulli draw (PyTorch: random.random() > p -> identity).
    u = jax.random.uniform(key, (), dtype=jnp.float32)
    gate = u <= jnp.float32(p)

    x2 = x.reshape(R, L)
    scale_rows = jnp.tile(scale.astype(jnp.float32), (B,)).reshape(R, 1)
    bias_rows = jnp.tile(bias.astype(jnp.float32), (B,)).reshape(R, 1)

    # Identity draw skips the kernel entirely; with x donated + output aliased,
    # the false branch is genuinely zero-HBM.
    out2 = jax.lax.cond(
        gate,
        lambda v: _affine_apply(v, scale_rows, bias_rows),
        lambda v: v,
        x2,
    )
    return out2.reshape(B, C, H, W)


# p is static (a constructor-time constant in the PyTorch module); x is donated
# so the affine can write in place and the identity branch needs no copy.
random_apply = jax.jit(_random_apply_impl, static_argnums=(3,), donate_argnums=(0,))


if __name__ == "__main__":
    B, C, H, W = 2, 4, 16, 16
    p = 0.7

    root = jax.random.PRNGKey(0)
    k_x, k_gate = jax.random.split(root)

    x = jax.random.normal(k_x, (B, C, H, W), dtype=jnp.float32)

    # Deterministic "fn" parameters (per-channel affine).
    scale = 1.0 + 0.1 * jnp.arange(C, dtype=jnp.float32)   # [1.0, 1.1, 1.2, 1.3]
    bias = 0.01 * jnp.arange(C, dtype=jnp.float32)         # [0.0, 0.01, 0.02, 0.03]

    # Reference (pure JAX) computed BEFORE the call: x is donated to the kernel.
    u = jax.random.uniform(k_gate, (), dtype=jnp.float32)
    fn_x = x * scale.reshape(1, C, 1, 1) + bias.reshape(1, C, 1, 1)
    ref = jnp.where(u <= p, fn_x, x)
    ref = jax.block_until_ready(ref)

    out = random_apply(x, scale, bias, p, k_gate)
    out = jax.block_until_ready(out)

    assert out.shape == ref.shape and out.dtype == ref.dtype
    assert jnp.allclose(out, ref, atol=1e-6), "mismatch vs reference"
    print("KERNEL_OK")
</pallas_src>

<mosaic_0001>
module attributes {stable_mosaic.version = 11 : i64} {
  func.func @_affine_kernel(%arg0: i32, %arg1: i32, %arg2: memref<8x128xf32, #tpu.memory_space<vmem>>, %arg3: memref<8x1xf32, #tpu.memory_space<vmem>>, %arg4: memref<8x1xf32, #tpu.memory_space<vmem>>, %arg5: memref<8x128xf32, #tpu.memory_space<vmem>>) attributes {dimension_semantics = [#tpu.dimension_semantics<parallel>, #tpu.dimension_semantics<parallel>], iteration_bounds = array<i64: 1, 2>, scalar_prefetch = 0 : i64, scratch_operands = 0 : i64, tpu.core_type = #tpu.core_type<tc>, window_params = [{transform_indices = @transform_0, window_bounds = array<i64: 8, 128>}, {transform_indices = @transform_1, window_bounds = array<i64: 8, 1>}, {transform_indices = @transform_2, window_bounds = array<i64: 8, 1>}, {transform_indices = @transform_3, window_bounds = array<i64: 8, 128>}]} {
    %c0 = arith.constant 0 : index
    %c0_0 = arith.constant 0 : index
    %0 = vector.load %arg2[%c0, %c0_0] : memref<8x128xf32, #tpu.memory_space<vmem>>, vector<8x128xf32>
    %c0_1 = arith.constant 0 : index
    %c0_2 = arith.constant 0 : index
    %1 = vector.load %arg3[%c0_1, %c0_2] : memref<8x1xf32, #tpu.memory_space<vmem>>, vector<8x1xf32>
    %2 = vector.broadcast %1 : vector<8x1xf32> to vector<8x128xf32>
    %3 = arith.mulf %0, %2 : vector<8x128xf32>
    %c0_3 = arith.constant 0 : index
    %c0_4 = arith.constant 0 : index
    %4 = vector.load %arg4[%c0_3, %c0_4] : memref<8x1xf32, #tpu.memory_space<vmem>>, vector<8x1xf32>
    %5 = vector.broadcast %4 : vector<8x1xf32> to vector<8x128xf32>
    %6 = arith.addf %3, %5 : vector<8x128xf32>
    %c0_5 = arith.constant 0 : index
    %c0_6 = arith.constant 0 : index
    %7 = vector.load %arg5[%c0_5, %c0_6] : memref<8x128xf32, #tpu.memory_space<vmem>>, vector<8x128xf32>
    tpu.vector_store %arg5[%c0_5, %c0_6], %6 {strides = array<i32>} : memref<8x128xf32, #tpu.memory_space<vmem>>, vector<8x128xf32>,
    return
  }
  func.func @transform_0(%arg0: i32, %arg1: i32) -> (i32, i32) {
    %c0_i32 = arith.constant 0 : i32
    return %arg0, %arg1 : i32, i32
  }
  func.func @transform_1(%arg0: i32, %arg1: i32) -> (i32, i32) {
    %c0_i32 = arith.constant 0 : i32
    %c0_i32_0 = arith.constant 0 : i32
    return %arg0, %c0_i32 : i32, i32
  }
  func.func @transform_2(%arg0: i32, %arg1: i32) -> (i32, i32) {
    %c0_i32 = arith.constant 0 : i32
    %c0_i32_0 = arith.constant 0 : i32
    return %arg0, %c0_i32 : i32, i32
  }
  func.func @transform_3(%arg0: i32, %arg1: i32) -> (i32, i32) {
    %c0_i32 = arith.constant 0 : i32
    return %arg0, %arg1 : i32, i32
  }
}

</mosaic_0001>

<bundles_post_ra>
// kernel: tile.3
= control target key start
LH: loop header
LB: loop body
LE: loop exit
PB: predicated region body
PF: predicated region fallthrough
CT: control target
= control target key end

     0   :  { %s22_s0 = inlined_call_operand.vmem [shape: f32[4], index: 0, kind: input, shape index: {}]   ;;  %s23_s1 = inlined_call_operand.vmem [shape: f32[2,4], index: 1, kind: output, shape index: {}]  }
   0x1   :  { %v4_v0 = vld [vmem:[%s22_s0] ss:$0 sm:$0xff] }
   0x2   :  { %5 = vst [vmem:[%s23_s1] sm:$0x3] %v4_v0 }

// kernel: tile.4
= control target key start
LH: loop header
LB: loop body
LE: loop exit
PB: predicated region body
PF: predicated region fallthrough
CT: control target
= control target key end

     0   :  { %s34_s8 = smov 125   ;;  %vm7_vm0 = vcmask 7168   ;;  %s35_s11 = smov 126   ;;  %s61_s0 = inlined_call_operand.vmem [shape: f32[2,4], index: 0, kind: input, shape index: {}]   ;;  %s62_s1 = inlined_call_operand.vmem [shape: f32[8,1], index: 1, kind: output, shape index: {}]  }
   0x1   :  { %v4_v0 = vld [vmem:[%s61_s0] sm:$0x3]  ;;  %s33_s0 = smov 127  }
   0x2   :  { %5 = vst [vmem:[#allocation0] sm:$0x3] %v4_v0 }
   0x9   :  { %v9_v1 = vld [vmem:[#allocation0] sm:$0x3]  }
   0xa   :  { %v21_v2 = vld [vmem:[#allocation0] sm:$0x3]   ;;  %10 = vrot.lane.b32.xlu0 %v9_v1, %s33_s0 }
   0xb   :  { %22 = vrot.lane.b32.xlu1 %v21_v2, %s34_s8  ;;  %v6_v3 = vld [vmem:[#allocation0] sm:$0x3]  }
   0xc   :  { %v15_v4 = vld [vmem:[#allocation0] sm:$0x3]   ;;  %8 = vst.msk [vmem:[%s62_s1] ss:$4 sm:$0x3] %vm7_vm0, %v6_v3  }
   0xe   :  { %16 = vrot.lane.b32.xlu0 %v15_v4, %s35_s11 }
  0x7c   :  { %v11_v5 = vpop.permute.xlu0 %10  }
  0x7d   :  { %v23_v6 = vpop.permute.xlu1 %22   ;;  %27 = vst.msk [vmem:[%s62_s1 + $0x1] ss:$4 sm:$0x3] %vm7_vm0, %v11_v5  }
  0x7e   :  { %29 = vst.msk [vmem:[%s62_s1 + $0x3] ss:$4 sm:$0x3] %vm7_vm0, %v23_v6  }
  0x80   :  { %v17_v7 = vpop.permute.xlu0 %16  }
  0x81   :  { %28 = vst.msk [vmem:[%s62_s1 + $0x2] ss:$4 sm:$0x3] %vm7_vm0, %v17_v7  }

// kernel: branch_1_fun.1
= control target key start
LH: loop header
LB: loop body
LE: loop exit
PB: predicated region body
PF: predicated region fallthrough
CT: control target
= control target key end

     0   :  { %s448_s12 = smov 0   ;;  %s450_s13 = smov 0   ;;  %s480_s0 = inlined_call_operand.vmem [shape: f32[8,256], index: 0, kind: input, shape index: {}, may-alias: {0,3}]   ;;  %s481_s1 = inlined_call_operand.vmem [shape: f32[8,1], index: 1, kind: input, shape index: {}]   ;;  %s482_s2 = inlined_call_operand.vmem [shape: f32[8,1], index: 2, kind: input, shape index: {}]   ;;  %s483_s3 = inlined_call_operand.vmem [shape: f32[8,256], index: 3, kind: output, shape index: {}, may-alias: {0,3}]  }
   0x1   :  { %s452_s14 = smov 0  }
   0x2 LB: > { %s22_s15 = sadd.s32 1, %s421_s13  ;;  %p372_p0 = scmp.ge.s32.totalorder %s425_s14, 1  ;;  %s425_s14 = sphi %s452_s14, %s13_s14   ;;  %s421_s13 = sphi %s450_s13, %s485_s13   ;;  %s417_s12 = sphi %s448_s12, %s484_s12  }
   0x3   : > { %p23_p1 = scmp.ge.s32.totalorder %s22_s15, 2  ;;  %p174_p2 = scmp.lt.s32.totalorder %s425_s14, 3 }
   0x5   : > { %s487_s15 = smov (%p23_p1, %s22_s15), 0  ;;  %p175_p3 = pnand %p372_p0, %p174_p2 }
   0x6   : > { %v237_v0 = vld [vmem:[%s481_s1] sm:$0xff] (!%p175_p3)  ;;  %v427_v1 = vmov (!%p175_p3), 0   ;;  %p214_p4 = scmp.lt.s32.totalorder (!%p175_p3), %s417_s12, 1 }
   0x7   : > { %178 = sbr.rel (%p175_p3) target bundleno = 143 (0x8f), region = 32  ;;  %402 = vset.pattern.permute.xlu0 (!%p175_p3), %v427_v1  ;;  %v244_v2 = vld [vmem:[%s482_s2] sm:$0xff] (!%p175_p3) }
   0x8   : > { %240 = vperm.xlu0 (!%p175_p3), %402, %v237_v0  }
   0xc   : > { %247 = vperm.xlu0 (!%p175_p3), %402, %v244_v2  }
   0xe   : > { %s489_s12 = smov (!%p214_p4, %s417_s12), 1 }
   0xf   : > { %s373_s20 = sshll.u32 %s489_s12, 3 }
  0x10   : > { %s219_s23 = scalar_lea.vmem %s480_s0, %s373_s20  ;;  %s235_s26 = scalar_lea.vmem %s483_s3, %s373_s20 }
  0x11   : > { %v236_v4 = vld [vmem:[%s219_s23] sm:$0xff] }
  0x87   : > { %v241_v3 = vpop.permute.xlu0 %240 }
  0x88   : > { %v243_v5 = vmul.f32 %v241_v3, %v236_v4 }
  0x8b   : > { %v248_v6 = vpop.permute.xlu0 %247 }
  0x8c   : > { %v250_v7 = vadd.f32 %v248_v6, %v243_v5 }
  0x8e   : > { %251 = vst [vmem:[%s235_s26] sm:$0xff] %v250_v7 }
  0x8f PF: > { %s13_s14 = sadd.s32 1, %s425_s14   ;;  %s484_s12 = smov %s421_s13 }
  0x90   : > { %p10_p5 = scmp.ge.s32.totalorder %s13_s14, 4   ;;  %s485_s13 = smov %s487_s15 }
  0x92   :  { %12 = sbr.rel (!%p10_p5) target bundleno = 2 (0x2), region = 68 }

</bundles_post_ra>
